<compile_context>
chip_gen: v7x
topology: tpu7x:2x2x1
jax: 0.10.0
libtpu: 0.0.40
codegen_flags: <defaults>
</compile_context>

<pallas_src>
import functools

import jax
import jax.numpy as jnp
from jax.experimental import pallas as pl
from jax.experimental.pallas import tpu as pltpu


def _round_up(n, m):
    return -(-n // m) * m


def _padded_vmem_bytes(rows, cols, itemsize):
    """Bytes a (rows, cols) operand really occupies in VMEM after sublane/128-lane padding."""
    sublane = 8 * (4 // itemsize)          # 8 rows for f32, 16 for bf16 (packed sublanes)
    return _round_up(rows, sublane) * _round_up(cols, 128) * itemsize


# ---------------------------------------------------------------------------
# Kernel: Linear -> ReLU -> Dropout[eval] -> Linear -> ReLU -> Dropout[eval]
# on "packed" operands: PACK consecutive batch rows share one lane-dense row and the
# weights are block-diagonal (PACK copies), so both matmuls and all loads/stores are
# lane-dense -- no masked stores from the narrow H4=16 output.
# ---------------------------------------------------------------------------
def _multitask_head_kernel(x_ref, w1_ref, b1_ref, w2_ref, b2_ref, o_ref):
    # x_ref : (TBp, PACK*Dx) f32      w1_ref: (PACK*Dx, PACK*H2) bf16
    # b1_ref: (1, PACK*H2)   f32      w2_ref: (PACK*H2, PACK*H4) bf16
    # b2_ref: (1, PACK*H4)   f32      o_ref : (TBp, PACK*H4)     f32 (or bf16)
    x = x_ref[...].astype(jnp.bfloat16)    # f32 streamed from HBM, cast on VPU (no extra HBM pass)
    # Layer 1: Linear over [x, cv].  The cv part is batch-invariant and already folded
    # into the bias (b1_eff = b1 + cv @ W1[Dx:]) by the hoisted prep step.
    h = jnp.dot(x, w1_ref[...], preferred_element_type=jnp.float32)   # f32 accumulation
    h = jnp.maximum(h + b1_ref[...], 0.0)  # bias + ReLU in f32 (v5e VPU has no bf16)
    # Dropout(drop_rate): identity (eval mode)
    # TODO(synk): training-mode Dropout would use pltpu.prng_seed / pltpu.prng_random_bits here.
    o = jnp.dot(h.astype(jnp.bfloat16), w2_ref[...], preferred_element_type=jnp.float32)
    o = jnp.maximum(o + b2_ref[...], 0.0)
    # Dropout: identity (eval mode)
    o_ref[...] = o.astype(o_ref.dtype)


# ---------------------------------------------------------------------------
# One-time (hoisted) prep: task-conditioning vector, cv->bias folding, block-diag packing.
# ---------------------------------------------------------------------------
def prepare_multitask_head_params(z, tasks, params, x_dim):
    """Run once per (params, z); the jitted forward below is the only per-batch work."""
    cv = jnp.concatenate([jnp.ravel(z[t]) for t in tasks]).astype(jnp.float32)[None, :]
    dc = cv.shape[1]
    w1 = jnp.asarray(params["w1"], jnp.float32)              # (Dx+Dc, H2), stored (in, out)
    b1 = jnp.asarray(params["b1"], jnp.float32).reshape(1, -1)
    w2 = jnp.asarray(params["w2"], jnp.float32)               # (H2, H4)
    b2 = jnp.asarray(params["b2"], jnp.float32).reshape(1, -1)
    assert w1.shape[0] == x_dim + dc, "hidden_channels must equal x_dim + cv_dim"
    h4 = w2.shape[1]

    # Pack factor: enough batch rows per lane-row that the packed output last dim >= 128.
    pack = max(1, -(-128 // h4))

    # Fold the batch-invariant cv @ W1[Dx:] term into the first bias (exact, f32).
    b1_eff = b1 + cv @ w1[x_dim:, :]

    eye = jnp.eye(pack, dtype=jnp.float32)
    return {
        # block-diagonal weights: `pack` copies of W on the diagonal (kron(I, W)), bf16 for MXU
        "w1": jnp.kron(eye, w1[:x_dim, :]).astype(jnp.bfloat16),   # (pack*Dx, pack*H2)
        "w2": jnp.kron(eye, w2).astype(jnp.bfloat16),              # (pack*H2, pack*H4)
        "b1": jnp.tile(b1_eff, (1, pack)),                         # (1, pack*H2) f32
        "b2": jnp.tile(b2, (1, pack)),                             # (1, pack*H4) f32
    }


# ---------------------------------------------------------------------------
# Per-batch forward (jitted; only pad/reshape + pallas_call + reshape/slice).
# ---------------------------------------------------------------------------
@functools.partial(jax.jit, static_argnames=("tile_rows", "out_dtype"))
def multitask_head_forward(x, head_ops, *, tile_rows=8192, out_dtype=jnp.float32):
    """x: (B, Dx) float32.  head_ops: output of prepare_multitask_head_params."""
    w1, b1, w2, b2 = head_ops["w1"], head_ops["b1"], head_ops["w2"], head_ops["b2"]
    B, dx = x.shape
    dxp, h2p = w1.shape
    h4p = w2.shape[1]
    pack = dxp // dx
    assert dxp == pack * dx and h2p == w2.shape[0], "inconsistent packed params vs x"
    h2, h4 = h2p // pack, h4p // pack

    # ---- pack `pack` consecutive batch rows into one lane-dense row (free, contiguous) ----
    b_pad = _round_up(B, pack)
    if b_pad != B:
        x = jnp.pad(x, ((0, b_pad - B), (0, 0)))       # padded rows computed then discarded
    bp = b_pad // pack
    xp = x.astype(jnp.float32).reshape(bp, dxp)         # contiguous -> layout-only reshape

    # ---- batch-tile selection ----
    # ~tile_rows batch rows per grid step (DMA >> 0.35us fixed per-step cost); for large
    # batches force >=2 steps so the "parallel" axis spans both v7x TensorCores.
    tbp_max = max(8, _round_up(max(1, tile_rows // pack), 8))
    if bp <= max(8, 4096 // pack):                       # small batch: single block, grid = 1
        tbp = bp
    else:
        tbp = min(tbp_max, _round_up((bp + 1) // 2, 8))  # >= 2 steps, tiles multiple of 8
    grid = (pl.cdiv(bp, tbp),)

    # ---- VMEM budget with (sublane, 128-lane) padding; streamed tiles + resident weights
    #      all counted double-buffered (default pipeliner). ----
    out_itemsize = jnp.dtype(out_dtype).itemsize
    vmem_est = (2 * _padded_vmem_bytes(tbp, dxp, 4)                       # x tile
                + 2 * _padded_vmem_bytes(tbp, h4p, out_itemsize)          # out tile
                + 2 * (_padded_vmem_bytes(dxp, h2p, 2)
                       + _padded_vmem_bytes(h2p, h4p, 2))                 # weights (bf16)
                + 2 * (_padded_vmem_bytes(1, h2p, 4)
                       + _padded_vmem_bytes(1, h4p, 4)))                  # biases (f32)
    # cap well under v7x's 64 MiB/TC physical VMEM; 32 MiB keeps headroom on every generation
    vmem_limit = int(min(32 << 20, max(8 << 20, 2 * vmem_est)))

    cost = pl.CostEstimate(
        flops=2 * b_pad * (dx * h2 + h2 * h4),           # useful flops (block-diag zeros excluded)
        transcendentals=0,
        bytes_accessed=int(bp * dxp * 4 + bp * h4p * out_itemsize
                           + w1.size * 2 + w2.size * 2 + (b1.size + b2.size) * 4),
    )

    out_packed = pl.pallas_call(
        _multitask_head_kernel,
        out_shape=jax.ShapeDtypeStruct((bp, h4p), out_dtype),
        grid=grid,
        in_specs=[
            pl.BlockSpec((tbp, dxp), lambda i: (i, 0)),   # x: streamed over batch (f32)
            pl.BlockSpec((dxp, h2p), lambda i: (0, 0)),   # W1 block-diag: VMEM-resident
            pl.BlockSpec((1, h2p), lambda i: (0, 0)),     # b1_eff (cv folded in): resident
            pl.BlockSpec((h2p, h4p), lambda i: (0, 0)),   # W2 block-diag: resident
            pl.BlockSpec((1, h4p), lambda i: (0, 0)),     # b2: resident
        ],
        out_specs=pl.BlockSpec((tbp, h4p), lambda i: (i, 0)),   # lane-dense (last dim >= 128)
        compiler_params=pltpu.CompilerParams(
            dimension_semantics=("parallel",),            # megacore split across grid steps (v7x)
            vmem_limit_bytes=vmem_limit),
        cost_estimate=cost,
    )(xp, w1, b1, w2, b2)

    # un-pack (free contiguous reshape) and drop the padded tail rows
    return out_packed.reshape(b_pad, h4)[:B]


if __name__ == "__main__":
    key = jax.random.PRNGKey(0)
    ks = jax.random.split(key, 8)

    # Small deterministic shapes consistent with the module:
    #   batch B=2, x feature dim Dx=40, three task embeddings of length 8
    #   => cv dim Dc=24, hidden_channels H = Dx + Dc = 64
    #   head (num_layers=3): Linear(64,32)+ReLU+Drop, Linear(32,16)+ReLU+Drop
    B, Dx = 2, 40
    tasks = ("style", "genre", "emotion")
    z = {
        "style":   jax.random.normal(ks[0], (8,), jnp.float32),
        "genre":   jax.random.normal(ks[1], (8,), jnp.float32),
        "emotion": jax.random.normal(ks[2], (8,), jnp.float32),
    }
    Dc = sum(int(z[t].size) for t in tasks)
    H = Dx + Dc                        # 64

    x = jax.random.normal(ks[3], (B, Dx), jnp.float32)

    params = {
        "w1": 0.1 * jax.random.normal(ks[4], (H, H // 2), jnp.float32),
        "b1": 0.1 * jax.random.normal(ks[5], (1, H // 2), jnp.float32),
        "w2": 0.1 * jax.random.normal(ks[6], (H // 2, H // 4), jnp.float32),
        "b2": 0.1 * jax.random.normal(ks[7], (1, H // 4), jnp.float32),
    }

    # one-time prep (hoisted out of the hot path), then the jitted forward
    head_ops = prepare_multitask_head_params(z, tasks, params, x_dim=Dx)
    out = multitask_head_forward(x, head_ops)
    out = jax.block_until_ready(out)

    # pure-JAX f32 reference of the PyTorch forward (eval mode)
    cv = jnp.concatenate([z[t].reshape(-1) for t in tasks])[None, :]
    cat = jnp.concatenate([x, jnp.broadcast_to(cv, (B, Dc))], axis=1)
    ref = jnp.maximum(cat @ params["w1"] + params["b1"], 0.0)
    ref = jnp.maximum(ref @ params["w2"] + params["b2"], 0.0)

    assert out.shape == (B, H // 4)
    assert out.dtype == jnp.float32
    # bf16 MXU operands -> tolerance ~1e-2 relative vs f32 reference
    assert jnp.allclose(out, ref, atol=3e-2, rtol=3e-2), "mismatch vs reference"
    print("KERNEL_OK")
</pallas_src>

<mosaic_0001>
module attributes {stable_mosaic.version = 11 : i64} {
  func.func @_multitask_head_kernel(%arg0: i32, %arg1: memref<1x320xf32, #tpu.memory_space<vmem>>, %arg2: memref<320x256xbf16, #tpu.memory_space<vmem>>, %arg3: memref<1x256xf32, #tpu.memory_space<vmem>>, %arg4: memref<256x128xbf16, #tpu.memory_space<vmem>>, %arg5: memref<1x128xf32, #tpu.memory_space<vmem>>, %arg6: memref<1x128xf32, #tpu.memory_space<vmem>>) attributes {dimension_semantics = [#tpu.dimension_semantics<parallel>], iteration_bounds = array<i64: 1>, scalar_prefetch = 0 : i64, scratch_operands = 0 : i64, tpu.core_type = #tpu.core_type<tc>, window_params = [{transform_indices = @transform_0, window_bounds = array<i64: 1, 320>}, {pipeline_mode = #tpu.pipeline_mode<synchronous>, transform_indices = @transform_1, window_bounds = array<i64: 320, 256>}, {pipeline_mode = #tpu.pipeline_mode<synchronous>, transform_indices = @transform_2, window_bounds = array<i64: 1, 256>}, {pipeline_mode = #tpu.pipeline_mode<synchronous>, transform_indices = @transform_3, window_bounds = array<i64: 256, 128>}, {pipeline_mode = #tpu.pipeline_mode<synchronous>, transform_indices = @transform_4, window_bounds = array<i64: 1, 128>}, {transform_indices = @transform_5, window_bounds = array<i64: 1, 128>}]} {
    %c0 = arith.constant 0 : index
    %c0_0 = arith.constant 0 : index
    %0 = vector.load %arg1[%c0, %c0_0] : memref<1x320xf32, #tpu.memory_space<vmem>>, vector<1x320xf32>
    %1 = arith.truncf %0 : vector<1x320xf32> to vector<1x320xbf16>
    %c0_1 = arith.constant 0 : index
    %c0_2 = arith.constant 0 : index
    %2 = vector.load %arg2[%c0_1, %c0_2] : memref<320x256xbf16, #tpu.memory_space<vmem>>, vector<320x256xbf16>
    %cst = arith.constant dense<0.000000e+00> : vector<1x256xf32>
    %3 = tpu.matmul %1, %2, %cst {dimension_numbers = #tpu.dot_dimension_numbers<[1], [0], [0], [1], [0, 0, 1, 1], [], []>} : vector<1x320xbf16>, vector<320x256xbf16>, vector<1x256xf32> -> vector<1x256xf32>
    %c0_3 = arith.constant 0 : index
    %c0_4 = arith.constant 0 : index
    %4 = vector.load %arg3[%c0_3, %c0_4] : memref<1x256xf32, #tpu.memory_space<vmem>>, vector<1x256xf32>
    %5 = arith.addf %3, %4 : vector<1x256xf32>
    %cst_5 = arith.constant 0.000000e+00 : f32
    %6 = vector.broadcast %cst_5 : f32 to vector<1x256xf32>
    %7 = arith.maximumf %5, %6 : vector<1x256xf32>
    %8 = arith.truncf %7 : vector<1x256xf32> to vector<1x256xbf16>
    %c0_6 = arith.constant 0 : index
    %c0_7 = arith.constant 0 : index
    %9 = vector.load %arg4[%c0_6, %c0_7] : memref<256x128xbf16, #tpu.memory_space<vmem>>, vector<256x128xbf16>
    %cst_8 = arith.constant dense<0.000000e+00> : vector<1x128xf32>
    %10 = tpu.matmul %8, %9, %cst_8 {dimension_numbers = #tpu.dot_dimension_numbers<[1], [0], [0], [1], [0, 0, 1, 1], [], []>} : vector<1x256xbf16>, vector<256x128xbf16>, vector<1x128xf32> -> vector<1x128xf32>
    %c0_9 = arith.constant 0 : index
    %c0_10 = arith.constant 0 : index
    %11 = vector.load %arg5[%c0_9, %c0_10] : memref<1x128xf32, #tpu.memory_space<vmem>>, vector<1x128xf32>
    %12 = arith.addf %10, %11 : vector<1x128xf32>
    %cst_11 = arith.constant 0.000000e+00 : f32
    %13 = vector.broadcast %cst_11 : f32 to vector<1x128xf32>
    %14 = arith.maximumf %12, %13 : vector<1x128xf32>
    %c0_12 = arith.constant 0 : index
    %c0_13 = arith.constant 0 : index
    %15 = vector.load %arg6[%c0_12, %c0_13] : memref<1x128xf32, #tpu.memory_space<vmem>>, vector<1x128xf32>
    tpu.vector_store %arg6[%c0_12, %c0_13], %14 {strides = array<i32>} : memref<1x128xf32, #tpu.memory_space<vmem>>, vector<1x128xf32>,
    return
  }
  func.func @transform_0(%arg0: i32) -> (i32, i32) {
    %c0_i32 = arith.constant 0 : i32
    %c0_i32_0 = arith.constant 0 : i32
    return %arg0, %c0_i32 : i32, i32
  }
  func.func @transform_1(%arg0: i32) -> (i32, i32) {
    %c0_i32 = arith.constant 0 : i32
    %c0_i32_0 = arith.constant 0 : i32
    %c0_i32_1 = arith.constant 0 : i32
    return %c0_i32, %c0_i32_0 : i32, i32
  }
  func.func @transform_2(%arg0: i32) -> (i32, i32) {
    %c0_i32 = arith.constant 0 : i32
    %c0_i32_0 = arith.constant 0 : i32
    %c0_i32_1 = arith.constant 0 : i32
    return %c0_i32, %c0_i32_0 : i32, i32
  }
  func.func @transform_3(%arg0: i32) -> (i32, i32) {
    %c0_i32 = arith.constant 0 : i32
    %c0_i32_0 = arith.constant 0 : i32
    %c0_i32_1 = arith.constant 0 : i32
    return %c0_i32, %c0_i32_0 : i32, i32
  }
  func.func @transform_4(%arg0: i32) -> (i32, i32) {
    %c0_i32 = arith.constant 0 : i32
    %c0_i32_0 = arith.constant 0 : i32
    %c0_i32_1 = arith.constant 0 : i32
    return %c0_i32, %c0_i32_0 : i32, i32
  }
  func.func @transform_5(%arg0: i32) -> (i32, i32) {
    %c0_i32 = arith.constant 0 : i32
    %c0_i32_0 = arith.constant 0 : i32
    return %arg0, %c0_i32 : i32, i32
  }
}

</mosaic_0001>

<bundles_post_ra>
// kernel: multitask_head_forward.1
= control target key start
LH: loop header
LB: loop body
LE: loop exit
PB: predicated region body
PF: predicated region fallthrough
CT: control target
= control target key end

     0   :  { %10 = vsyncpa [#allocation3], 0  ;;  %s889_s0 = inlined_call_operand.vmem [shape: f32[1,320], index: 0, kind: input, shape index: {}]   ;;  %s890_s1 = inlined_call_operand.hbm [shape: bf16[320,256], index: 1, kind: input, shape index: {}]   ;;  %s891_s2 = inlined_call_operand.vmem [shape: f32[1,256], index: 2, kind: input, shape index: {}]   ;;  %s892_s3 = inlined_call_operand.hbm [shape: bf16[256,128], index: 3, kind: input, shape index: {}]   ;;  %s893_s4 = inlined_call_operand.vmem [shape: f32[1,128], index: 4, kind: input, shape index: {}]   ;;  %s894_s5 = inlined_call_operand.vmem [shape: f32[1,128], index: 5, kind: output, shape index: {}]  }
   0x1   :  { %11 = vsyncpa [#allocation5], 0  ;;  %s802_s18 = smov [#allocation2]   ;;  %s754_s22 = scalar_lea.hbm %s890_s1, 5120 }
   0x2   :  { %s19_s19 = sshll.u32 %s802_s18, 4  ;;  %p755_p0 = scmp.ne.s32.totalorder %s890_s1, %s754_s22  ;;  %s20_s19 = int_to_ptr.vmem [resolvable:$true] %s19_s19 }
   0x3   :  { %p758_p1 = scmp.lt.u32.totalorder %s754_s22, %s890_s1 }
   0x5   :  { %p760_p2 = pnand %p758_p1, %p755_p0 }
   0x7   :  { %763 = shalt.err (!%p760_p2)
}
   0x8   :  { %s764_s27 = scalar_lea.vmem %s20_s19, 5120  ;;  %p769_p4 = scmp.lt.s32.totalorder %s20_s19, %s20_s19 }
   0x9   :  { %p765_p3 = scmp.ne.s32.totalorder %s20_s19, %s764_s27  ;;  %p770_p5 = scmp.lt.s32.totalorder %s764_s27, %s764_s27 }
   0xb   :  { %p771_p6 = por %p770_p5, %p769_p4 }
   0xd   :  { %p772_p7 = pnand %p771_p6, %p765_p3 }
   0xf   :  { %775 = shalt.err (!%p772_p7)
}
  0x10   :  { %s803_s28 = smov 128   ;;  %s804_s29 = smov 8  }
  0x11   :  { %25 = dma.hbm_to_vmem [thread:$0]  %s890_s1, 5120, %s20_s19, [#allocation3], %s803_s28, %s803_s28, %s804_s29  }
  0x12   :  { %s805_s7 = smov [#allocation4]   ;;  %s776_s11 = scalar_lea.hbm %s892_s3, 2048 }
  0x13   :  { %s33_s8 = sshll.u32 %s805_s7, 4  ;;  %p777_p8 = scmp.ne.s32.totalorder %s892_s3, %s776_s11  ;;  %s34_s8 = int_to_ptr.vmem [resolvable:$true] %s33_s8 }
  0x14   :  { %p780_p9 = scmp.lt.u32.totalorder %s776_s11, %s892_s3 }
  0x16   :  { %p782_p10 = pnand %p780_p9, %p777_p8 }
  0x18   :  { %785 = shalt.err (!%p782_p10)
}
  0x19   :  { %s786_s16 = scalar_lea.vmem %s34_s8, 2048  ;;  %p791_p12 = scmp.lt.s32.totalorder %s34_s8, %s34_s8 }
  0x1a   :  { %p787_p11 = scmp.ne.s32.totalorder %s34_s8, %s786_s16  ;;  %p792_p13 = scmp.lt.s32.totalorder %s786_s16, %s786_s16 }
  0x1c   :  { %p793_p0 = por %p792_p13, %p791_p12 }
  0x1e   :  { %p794_p1 = pnand %p793_p0, %p787_p11 }
  0x20   :  { %797 = shalt.err (!%p794_p1)
}
  0x21   :  { %s806_s1 = smov 64   ;;  %s807_s17 = smov 4  }
  0x22   :  { %39 = dma.hbm_to_vmem [thread:$0]  %s892_s3, 2048, %s34_s8, [#allocation5], %s806_s1, %s806_s1, %s807_s17  }
  0x23   :  { %798 = dma.done.wait [#allocation3], 5120  }
  0x24   :  { %799 = vsyncadd [#allocation3], 4294962176 }
  0x25   :  { %800 = dma.done.wait [#allocation5], 2048  }
  0x26   :  { %801 = vsyncadd [#allocation5], 4294965248  ;;  %v808_v0 = vmov 0   ;;  %v678_v1 = vld [vmem:[#allocation2 + $0x4] ss:$8 sps:$4 sm:$0xff]   ;;  %v51_v12 = vlaneseq  ;;  %vm321_vm0 = vcmask 523264  }
  0x27   :  { %398 = vmatprep.mubr.bf16.mxu1 %v808_v0  ;;  %v680_v2 = vld [vmem:[#allocation2] ss:$8 sps:$4 sm:$0xff]   ;;  %325 = vmatprep.subr.bf16.mxu0 %v678_v1  ;;  %v681_v3 = vld [vmem:[#allocation2 + $0x14] ss:$8 sps:$4 sm:$0xff]   ;;  %v683_v4 = vld [vmem:[#allocation2 + $0x10] ss:$8 sps:$4 sm:$0xff]  }
  0x28   :  { %326 = vmatpush1.bf16.msra.mxu0 %v680_v2  ;;  %v684_v5 = vld [vmem:[#allocation2 + $0x24] ss:$8 sps:$4 sm:$0xff]   ;;  %v686_v6 = vld [vmem:[#allocation2 + $0x20] ss:$8 sps:$4 sm:$0xff]   ;;  %v687_v7 = vld [vmem:[#allocation2 + $0x34] ss:$8 sps:$4 sm:$0xff]  }
  0x29   :  { %327 = vmatprep.subr.bf16.mxu0 %v681_v3  ;;  %v689_v8 = vld [vmem:[#allocation2 + $0x30] ss:$8 sps:$4 sm:$0xff]   ;;  %v690_v9 = vld [vmem:[#allocation2 + $0x44] ss:$8 sps:$4 sm:$0xff]   ;;  %v692_v10 = vld [vmem:[#allocation2 + $0x40] ss:$8 sps:$4 sm:$0xff]  }
  0x2a   :  { %v693_v11 = vld [vmem:[#allocation2 + $0x54] ss:$8 sps:$4 sm:$0xff]   ;;  %v714_v13 = vld [vmem:[#allocation2 + $0x104] ss:$8 sps:$4 sm:$0xff]   ;;  %v695_v14 = vld [vmem:[#allocation2 + $0x50] ss:$8 sps:$4 sm:$0xff]  }
  0x2b   :  { %366 = vmatprep.subr.bf16.mxu1 %v714_v13  ;;  %v718_v15 = vld [vmem:[#allocation2 + $0x100] ss:$8 sps:$4 sm:$0xff]   ;;  %v720_v16 = vld [vmem:[#allocation2 + $0x114] ss:$8 sps:$4 sm:$0xff]   ;;  %v863_v17 = vshrl.u32 %v51_v12, 7 }
  0x2c   :  { %328 = vmatpush1.bf16.msra.mxu0 %v683_v4  ;;  %v696_v18 = vld [vmem:[#allocation2 + $0x64] ss:$8 sps:$4 sm:$0xff]   ;;  %367 = vmatpush1.bf16.msra.mxu1 %v718_v15  ;;  %v724_v19 = vld [vmem:[#allocation2 + $0x110] ss:$8 sps:$4 sm:$0xff]   ;;  %v698_v21 = vld [vmem:[#allocation2 + $0x60] ss:$8 sps:$4 sm:$0xff]  }
  0x2d   :  { %329 = vmatprep.subr.bf16.mxu0 %v684_v5  ;;  %368 = vmatprep.subr.bf16.mxu1 %v720_v16  ;;  %v726_v20 = vld [vmem:[#allocation2 + $0x124] ss:$8 sps:$4 sm:$0xff]   ;;  %v699_v22 = vld [vmem:[#allocation2 + $0x74] ss:$8 sps:$4 sm:$0xff]   ;;  %v57_v23 = vsub.s32 1, %v863_v17  ;;  %v61_v24 = vsub.s32 2, %v863_v17 }
  0x2e   :  { %v730_v25 = vld [vmem:[#allocation2 + $0x120] ss:$8 sps:$4 sm:$0xff]   ;;  %v732_v26 = vld [vmem:[#allocation2 + $0x134] ss:$8 sps:$4 sm:$0xff]   ;;  %v701_v27 = vld [vmem:[#allocation2 + $0x70] ss:$8 sps:$4 sm:$0xff]  }
  0x2f   :  { %v870_v28 = vld [vmem:[%s889_s0] sm:$0x7]  ;;  %v702_v29 = vld [vmem:[#allocation2 + $0x84] ss:$8 sps:$4 sm:$0xff]   ;;  %v736_v32 = vld [vmem:[#allocation2 + $0x130] ss:$8 sps:$4 sm:$0xff]  }
  0x30   :  { %330 = vmatpush1.bf16.msra.mxu0 %v686_v6  ;;  %369 = vmatpush1.bf16.msra.mxu1 %v724_v19  ;;  %v58_v30 = vrot.slane %v870_v28, %v57_v23  ;;  %v62_v31 = vrot.slane %v870_v28, %v61_v24  ;;  %v738_v34 = vld [vmem:[#allocation4 + $0x40] sm:$0xff]   ;;  %v705_v36 = vld [vmem:[#allocation2 + $0x94] ss:$8 sps:$4 sm:$0xff]   ;;  %v707_v39 = vld [vmem:[#allocation2 + $0x90] ss:$8 sps:$4 sm:$0xff]   ;;  %v53_v57 = vsub.s32 0, %v863_v17 }
  0x31   :  { %331 = vmatprep.subr.bf16.mxu0 %v687_v7  ;;  %370 = vmatprep.subr.bf16.mxu1 %v726_v20  ;;  %v704_v35 = vld [vmem:[#allocation2 + $0x80] ss:$8 sps:$4 sm:$0xff]   ;;  %v708_v41 = vld [vmem:[#allocation2 + $0xa4] ss:$8 sps:$4 sm:$0xff]   ;;  %v742_v43 = vld [vmem:[#allocation4 + $0x50] sm:$0xff]  }
  0x32   :  { %v67_v33 = vpack.c.bf16 %v58_v30, %v58_v30  ;;  %v68_v37 = vpack.c.bf16 %v62_v31, %v62_v31  ;;  %v739_v38 = vld [vmem:[#allocation4] sm:$0xff]   ;;  %v740_v40 = vld [vmem:[#allocation4 + $0x48] sm:$0xff]   ;;  %v711_v45 = vld [vmem:[#allocation2 + $0xb4] ss:$8 sps:$4 sm:$0xff]   ;;  %v54_v60 = vrot.slane %v870_v28, %v53_v57 }
  0x33   :  { %v741_v42 = vld [vmem:[#allocation4 + $0x8] sm:$0xff]   ;;  %v743_v46 = vld [vmem:[#allocation4 + $0x10] sm:$0xff]   ;;  %v744_v47 = vld [vmem:[#allocation4 + $0x58] sm:$0xff]  }
  0x34   :  { %332 = vmatpush1.bf16.msra.mxu0 %v689_v8  ;;  %371 = vmatpush1.bf16.msra.mxu1 %v730_v25  ;;  %v710_v44 = vld [vmem:[#allocation2 + $0xa0] ss:$8 sps:$4 sm:$0xff]   ;;  %v713_v48 = vld [vmem:[#allocation2 + $0xb0] ss:$8 sps:$4 sm:$0xff]   ;;  %v716_v49 = vld [vmem:[#allocation2 + $0xc4] ss:$8 sps:$4 sm:$0xff]   ;;  %v66_v62 = vpack.c.bf16 %v54_v60, %v54_v60 }
  0x35   :  { %333 = vmatprep.subr.bf16.mxu0 %v690_v9  ;;  %372 = vmatprep.subr.bf16.mxu1 %v732_v26  ;;  %v745_v50 = vld [vmem:[#allocation4 + $0x18] sm:$0xff]   ;;  %v746_v51 = vld [vmem:[#allocation4 + $0x60] sm:$0xff]   ;;  %v748_v63 = vld [vmem:[#allocation4 + $0x68] sm:$0xff]  }
  0x36   :  { %357 = vmatprep.mubr.bf16.mxu0 %v67_v33  ;;  %v719_v52 = vld [vmem:[#allocation2 + $0xc0] ss:$8 sps:$4 sm:$0xff]   ;;  %v722_v53 = vld [vmem:[#allocation2 + $0xd4] ss:$8 sps:$4 sm:$0xff]   ;;  %v725_v55 = vld [vmem:[#allocation2 + $0xd0] ss:$8 sps:$4 sm:$0xff]  }
  0x37   :  { %v747_v54 = vld [vmem:[#allocation4 + $0x20] sm:$0xff]   ;;  %v734_v59 = vld [vmem:[#allocation2 + $0xf4] ss:$8 sps:$4 sm:$0xff]   ;;  %v737_v61 = vld [vmem:[#allocation2 + $0xf0] ss:$8 sps:$4 sm:$0xff]  }
  0x38   :  { %334 = vmatpush1.bf16.msra.mxu0 %v692_v10  ;;  %373 = vmatpush1.bf16.msra.mxu1 %v736_v32  ;;  %v728_v56 = vld [vmem:[#allocation2 + $0xe4] ss:$8 sps:$4 sm:$0xff]   ;;  %v731_v58 = vld [vmem:[#allocation2 + $0xe0] ss:$8 sps:$4 sm:$0xff]   ;;  %v750_v1 = vld [vmem:[#allocation4 + $0x70] sm:$0xff]  }
  0x39   :  { %335 = vmatprep.subr.bf16.mxu0 %v693_v11  ;;  %645 = vmatprep.subr.bf16.mxu1 %v738_v34  ;;  %v749_v0 = vld [vmem:[#allocation4 + $0x28] sm:$0xff]   ;;  %v751_v2 = vld [vmem:[#allocation4 + $0x30] sm:$0xff]   ;;  %v752_v3 = vld [vmem:[#allocation4 + $0x78] sm:$0xff]  }
  0x3a   :  { %v753_v4 = vld [vmem:[#allocation4 + $0x38] sm:$0xff]   ;;  %v109_v9 = vld [vmem:[%s891_s2] sm:$0x3] }
  0x3b   :  { %628 = vmatmul.mubr.msk.bf16.vlgmr.msra.gmra.mrb[0].mxu1 %vm321_vm0, %v68_v37  ;;  %v314_v10 = vrot.slane %v109_v9, %v53_v57  ;;  %v318_v11 = vrot.slane %v109_v9, %v57_v23  ;;  %v443_v17 = vld [vmem:[%s893_s4] sm:$0x1] }
  0x3c   :  { %336 = vmatpush1.bf16.msra.mxu0 %v695_v14  ;;  %646 = vmatpush3.bf16.msra.mxu1 %v739_v38 }
  0x3d   :  { %337 = vmatprep.subr.bf16.mxu0 %v696_v18  ;;  %647 = vmatprep.subr.bf16.mxu1 %v740_v40 }
  0x40   :  { %338 = vmatpush1.bf16.msra.mxu0 %v698_v21  ;;  %648 = vmatpush3.bf16.msra.mxu1 %v741_v42 }
  0x41   :  { %339 = vmatprep.subr.bf16.mxu0 %v699_v22  ;;  %649 = vmatprep.subr.bf16.mxu1 %v742_v43 }
  0x44   :  { %340 = vmatpush1.bf16.msra.mxu0 %v701_v27  ;;  %650 = vmatpush3.bf16.msra.mxu1 %v743_v46 }
  0x45   :  { %341 = vmatprep.subr.bf16.mxu0 %v702_v29  ;;  %651 = vmatprep.subr.bf16.mxu1 %v744_v47 }
  0x48   :  { %342 = vmatpush1.bf16.msra.mxu0 %v704_v35  ;;  %652 = vmatpush3.bf16.msra.mxu1 %v745_v50 }
  0x49   :  { %343 = vmatprep.subr.bf16.mxu0 %v705_v36  ;;  %653 = vmatprep.subr.bf16.mxu1 %v746_v51 }
  0x4c   :  { %344 = vmatpush1.bf16.msra.mxu0 %v707_v39  ;;  %654 = vmatpush3.bf16.msra.mxu1 %v747_v54 }
  0x4d   :  { %345 = vmatprep.subr.bf16.mxu0 %v708_v41  ;;  %655 = vmatprep.subr.bf16.mxu1 %v748_v63 }
  0x50   :  { %346 = vmatpush1.bf16.msra.mxu0 %v710_v44  ;;  %656 = vmatpush3.bf16.msra.mxu1 %v749_v0 }
  0x51   :  { %347 = vmatprep.subr.bf16.mxu0 %v711_v45  ;;  %657 = vmatprep.subr.bf16.mxu1 %v750_v1 }
  0x54   :  { %348 = vmatpush1.bf16.msra.mxu0 %v713_v48  ;;  %658 = vmatpush3.bf16.msra.mxu1 %v751_v2 }
  0x55   :  { %349 = vmatprep.subr.bf16.mxu0 %v716_v49  ;;  %659 = vmatprep.subr.bf16.mxu1 %v752_v3 }
  0x58   :  { %350 = vmatpush1.bf16.msra.mxu0 %v719_v52  ;;  %660 = vmatpush3.bf16.msra.mxu1 %v753_v4 }
  0x59   :  { %351 = vmatprep.subr.bf16.mxu0 %v722_v53 }
  0x5c   :  { %352 = vmatpush1.bf16.msra.mxu0 %v725_v55 }
  0x5d   :  { %353 = vmatprep.subr.bf16.mxu0 %v728_v56 }
  0x60   :  { %354 = vmatpush1.bf16.msra.mxu0 %v731_v58 }
  0x61   :  { %355 = vmatprep.subr.bf16.mxu0 %v734_v59 }
  0x64   :  { %356 = vmatpush1.bf16.msra.mxu0 %v737_v61 }
  0x67   :  { %358 = vmatmul.mubr.bf16.vlgmr.msra.gmra.mrb[0].mxu0 %v66_v62 }
 0x10e   :  { %v400_v5 = vpop.f32.mrb[0].mxu1 }
 0x10f   :  { %v402_v6 = vpop.f32.mrb[1].mxu1 }
 0x110   :  { %v404_v7 = vpop.f32.mrb[2].mxu1 }
 0x111   :  { %v405_v8 = vpop.f32.mrb[3].mxu1 }
 0x13a   :  { %v359_v12 = vpop.f32.mrb[0].mxu0 }
 0x13b   :  { %v360_v13 = vadd.f32 %v359_v12, %v314_v10  ;;  %v361_v14 = vpop.f32.mrb[1].mxu0 }
 0x13c   :  { %v362_v15 = vadd.f32 %v361_v14, %v318_v11  ;;  %v363_v16 = vpop.f32.mrb[2].mxu0 }
 0x13d   :  { %v401_v18 = vadd.f32 %v400_v5, %v360_v13  ;;  %v364_v19 = vpop.f32.mrb[3].mxu0 }
 0x13e   :  { %v403_v20 = vadd.f32 %v402_v6, %v362_v15 }
 0x13f   :  { %v407_v21 = vmax.f32 %v401_v18, 0.0 }
 0x140   :  { %v408_v22 = vmax.f32 %v403_v20, 0.0 }
 0x141   :  { %v409_v25 = vpack.c.bf16 %v407_v21, %v407_v21 }
 0x142   :  { %v410_v24 = vpack.c.bf16 %v408_v22, %v408_v22 }
 0x144   :  { %572 = vmatprep.mubr.bf16.mxu1 %v410_v24 }
 0x145   :  { %573 = vmatmul.mubr.bf16.vlgmr.msra.gmra.mrb[4].mxu1 %v409_v25 }
 0x218   :  { %v661_v26 = vpop.f32.mrb[4].mxu1 }
 0x219   :  { %v662_v23 = vpop.f32.mrb[5].mxu1 }
 0x21a   :  { %v663_v27 = vadd.f32 %v662_v23, %v661_v26  ;;  %v664_v28 = vpop.f32.mrb[6].mxu1 }
 0x21b   :  { %v665_v29 = vpop.f32.mrb[7].mxu1 }
 0x21c   :  { %v575_v30 = vadd.f32 %v663_v27, %v443_v17 }
 0x21e   :  { %v580_v31 = vmax.f32 %v575_v30, 0.0 }
 0x220   :  { %581 = vst [vmem:[%s894_s5] sm:$0x1] %v580_v31 }
 0x221   :  { %586 = vsyncpa [#allocation3], 1 }
 0x222   :  { %587 = vsyncpa [#allocation5], 1 }

</bundles_post_ra>
